<compile_context>
chip_gen: v7x
topology: tpu7x:2x2x1
jax: 0.10.0
libtpu: 0.0.40
codegen_flags: <defaults>
</compile_context>

<pallas_src>
import numpy as np
import jax
import jax.numpy as jnp
from jax.experimental import pallas as pl
from jax.experimental.pallas import tpu as pltpu


def _make_ce_kernel(n_rows, tile_n, num_classes):
    """Kernel over one (tile_n, C) logits block; emits partial sum & count."""

    def kernel(x_ref, y_ref, loss_ref, cnt_ref):
        # x_ref:   (tile_n, C)  logits in their NATIVE dtype (bf16 stays bf16)
        # y_ref:   (tile_n, 1)  int32 targets (-100 / out-of-range = ignored)
        # loss_ref,(1, 1, 128)  f32 lane-dense per-tile partial loss sum
        # cnt_ref: (1, 1, 128)  f32 lane-dense per-tile valid-target count
        x = x_ref[...]                                    # (T, C) native dtype
        y = y_ref[...]                                    # (T, 1) int32

        # Row mask for the ragged last tile (no host-side padding of x):
        # rows >= n_rows hold unspecified data and must be masked with where().
        row0 = pl.program_id(0) * tile_n
        row_ids = row0 + jax.lax.broadcasted_iota(jnp.int32, (tile_n, 1), 0)
        in_bounds = row_ids < n_rows                      # (T, 1) bool
        tgt_valid = jnp.logical_and(y >= 0, y < num_classes)
        valid = jnp.logical_and(in_bounds, tgt_valid)     # (T, 1) bool

        # Row max and target gather in the native input dtype (exact for bf16;
        # avoids materializing a full f32 copy of the tile for these passes).
        m = jnp.max(x, axis=1, keepdims=True)             # (T, 1) native
        classes = jax.lax.broadcasted_iota(jnp.int32, x.shape, 1)
        x_tgt = jnp.sum(jnp.where(classes == y, x, jnp.zeros_like(x)),
                        axis=1, keepdims=True)            # (T, 1) native (exact)

        # Numerically stable log-sum-exp: upcast only inside exp / accumulation.
        m32 = m.astype(jnp.float32)
        p = jnp.exp(x.astype(jnp.float32) - m32)          # (T, C) f32, <= 1.0
        lse = jnp.log(jnp.sum(p, axis=1, keepdims=True))  # (T, 1) f32

        # per-row NLL:  -log_softmax(x)[y] == m + lse - x[y];  where() (not *mask)
        # so garbage in OOB rows cannot produce inf/NaN in the sum.
        per_row = jnp.where(valid, m32 + lse - x_tgt.astype(jnp.float32), 0.0)
        valid_f = valid.astype(jnp.float32)

        loss_ref[...] = jnp.full(loss_ref.shape, jnp.sum(per_row), jnp.float32)
        cnt_ref[...] = jnp.full(cnt_ref.shape, jnp.sum(valid_f), jnp.float32)

    return kernel


def _round_up(v, m):
    return ((v + m - 1) // m) * m


def cross_entropy_loss(x, y):
    """Pallas equivalent of the PyTorch CrossEntropyLoss.forward.

    x: (N, C) logits (any float dtype; kept in native dtype for the HBM DMA).
    y: (N,) integer class indices; -100 (or any out-of-range value) is ignored.
    Returns (loss, ('01. cross_entropy loss: ', loss)); `loss` stays on device.
    """
    n, c = x.shape
    itemsize = jnp.dtype(x.dtype).itemsize
    # Sublane alignment of the row-block (f32: 8, bf16: 16, int8/fp8: 32).
    align = {4: 8, 2: 16, 1: 32}.get(itemsize, 8)

    # --- tile-size selection ------------------------------------------------
    # VMEM working-set per row of a tile:
    #   * logits block:            c * itemsize   (x2, double-buffered)
    #   * in-kernel f32 exp temps: c * 4          (x2, conservative)
    #   * int32 target column, lane-padded to 128 lanes: 512 B (x2 buffers)
    vmem_tile_budget = 24 * 1024 * 1024            # well under the 48 MiB limit
    per_row_bytes = 2 * c * itemsize + 2 * c * 4 + 2 * 512
    tile_n = vmem_tile_budget // per_row_bytes
    tile_n = int(max(align, min(4096, (tile_n // align) * align)))

    # Never tile bigger than the (alignment-rounded) batch ...
    tile_n = min(tile_n, _round_up(n, align))
    # ... and keep >= 2 grid steps when the batch can be split, so the
    # "parallel" batch axis can shard across v7x's two TensorCores.
    if n > align:
        half = _round_up((n + 1) // 2, align)
        tile_n = min(tile_n, half)

    num_tiles = (n + tile_n - 1) // tile_n         # ragged last tile is masked

    # Targets: tiny, so the (N, 1) int32 column is cheap; its lane-padded VMEM
    # cost (512 B/row x2 buffers) is included in per_row_bytes above.
    y2d = y.astype(jnp.int32).reshape(n, 1)

    kernel = _make_ce_kernel(n, tile_n, c)

    loss_parts, cnt_parts = pl.pallas_call(
        kernel,
        out_shape=(
            jax.ShapeDtypeStruct((num_tiles, 1, 128), jnp.float32),
            jax.ShapeDtypeStruct((num_tiles, 1, 128), jnp.float32),
        ),
        grid=(num_tiles,),
        in_specs=[
            # NOTE: if a profile shows exposed DMA on the logits stream, add
            # pipeline_mode=pl.Buffered(3) here (and budget 3x the input tile).
            pl.BlockSpec((tile_n, c), lambda i: (i, 0)),
            pl.BlockSpec((tile_n, 1), lambda i: (i, 0)),
        ],
        out_specs=(
            pl.BlockSpec((1, 1, 128), lambda i: (i, 0, 0)),
            pl.BlockSpec((1, 1, 128), lambda i: (i, 0, 0)),
        ),
        compiler_params=pltpu.CompilerParams(
            dimension_semantics=("parallel",),
            vmem_limit_bytes=48 * 1024 * 1024,     # <= v7x headroom; fine on v5e/v6e
        ),
    )(x, y2d)

    total_loss = jnp.sum(loss_parts[:, 0, 0])
    total_cnt = jnp.sum(cnt_parts[:, 0, 0])
    loss = total_loss / total_cnt                  # mean over non-ignored targets

    # Keep the module's return structure, but do NOT force a device->host copy.
    return loss, ('01. cross_entropy loss: ', loss)


if __name__ == "__main__":
    key = jax.random.PRNGKey(0)
    kx, ky, kx2, ky2, kx3, ky3 = jax.random.split(key, 6)

    # --- case 1: plain f32 batch, matches the original demo shape ----------
    N, C = 8, 32
    x = jax.random.normal(kx, (N, C), dtype=jnp.float32)
    y = jax.random.randint(ky, (N,), 0, C, dtype=jnp.int32)

    loss, _info = cross_entropy_loss(x, y)
    loss = jax.block_until_ready(loss)
    ref = -jnp.mean(
        jnp.take_along_axis(jax.nn.log_softmax(x, axis=1), y[:, None], axis=1)
    )
    assert np.allclose(np.asarray(loss), np.asarray(ref), rtol=1e-5, atol=1e-5)

    # --- case 2: non-multiple-of-8 batch (ragged last tile, no host pad)
    #             plus one ignore_index=-100 target ------------------------
    N2 = 10
    x2 = jax.random.normal(kx2, (N2, C), dtype=jnp.float32)
    y2 = jax.random.randint(ky2, (N2,), 0, C, dtype=jnp.int32)
    y2 = y2.at[3].set(-100)

    loss2, _ = cross_entropy_loss(x2, y2)
    loss2 = jax.block_until_ready(loss2)
    logp2 = jax.nn.log_softmax(x2, axis=1)
    valid2 = (y2 >= 0) & (y2 < C)
    picked2 = jnp.take_along_axis(logp2, jnp.clip(y2, 0, C - 1)[:, None], axis=1)[:, 0]
    ref2 = -jnp.sum(jnp.where(valid2, picked2, 0.0)) / jnp.sum(valid2)
    assert np.allclose(np.asarray(loss2), np.asarray(ref2), rtol=1e-5, atol=1e-5)

    # --- case 3: bf16 logits (native-dtype max/gather path) ----------------
    N3, C3 = 16, 128
    x3 = jax.random.normal(kx3, (N3, C3), dtype=jnp.float32).astype(jnp.bfloat16)
    y3 = jax.random.randint(ky3, (N3,), 0, C3, dtype=jnp.int32)

    loss3, _ = cross_entropy_loss(x3, y3)
    loss3 = jax.block_until_ready(loss3)
    x3f = x3.astype(jnp.float32)
    ref3 = -jnp.mean(
        jnp.take_along_axis(jax.nn.log_softmax(x3f, axis=1), y3[:, None], axis=1)
    )
    assert np.allclose(np.asarray(loss3), np.asarray(ref3), rtol=1e-3, atol=1e-3)

    print("KERNEL_OK")
</pallas_src>

<mosaic_0001>
module attributes {stable_mosaic.version = 11 : i64} {
  func.func @kernel(%arg0: i32, %arg1: memref<8x32xf32, #tpu.memory_space<vmem>>, %arg2: memref<8x1xi32, #tpu.memory_space<vmem>>, %arg3: memref<1x1x128xf32, #tpu.memory_space<vmem>>, %arg4: memref<1x1x128xf32, #tpu.memory_space<vmem>>) attributes {dimension_semantics = [#tpu.dimension_semantics<parallel>], iteration_bounds = array<i64: 1>, scalar_prefetch = 0 : i64, scratch_operands = 0 : i64, tpu.core_type = #tpu.core_type<tc>, window_params = [{transform_indices = @transform_0, window_bounds = array<i64: 8, 32>}, {transform_indices = @transform_1, window_bounds = array<i64: 8, 1>}, {transform_indices = @transform_2, window_bounds = array<i64: 1, 1, 128>}, {transform_indices = @transform_3, window_bounds = array<i64: 1, 1, 128>}]} {
    %c0 = arith.constant 0 : index
    %c0_0 = arith.constant 0 : index
    %0 = vector.load %arg1[%c0, %c0_0] : memref<8x32xf32, #tpu.memory_space<vmem>>, vector<8x32xf32>
    %c0_1 = arith.constant 0 : index
    %c0_2 = arith.constant 0 : index
    %1 = vector.load %arg2[%c0_1, %c0_2] : memref<8x1xi32, #tpu.memory_space<vmem>>, vector<8x1xi32>
    %c8_i32 = arith.constant 8 : i32
    %2 = arith.muli %arg0, %c8_i32 : i32
    %3 = tpu.iota {dimensions = array<i32: 0>} : vector<8x1xi32>
    %4 = vector.broadcast %2 : i32 to vector<8x1xi32>
    %5 = arith.addi %4, %3 : vector<8x1xi32>
    %c8_i32_3 = arith.constant 8 : i32
    %6 = vector.broadcast %c8_i32_3 : i32 to vector<8x1xi32>
    %7 = arith.cmpi slt, %5, %6 : vector<8x1xi32>
    %c0_i32 = arith.constant 0 : i32
    %8 = vector.broadcast %c0_i32 : i32 to vector<8x1xi32>
    %9 = arith.cmpi sge, %1, %8 : vector<8x1xi32>
    %c32_i32 = arith.constant 32 : i32
    %10 = vector.broadcast %c32_i32 : i32 to vector<8x1xi32>
    %11 = arith.cmpi slt, %1, %10 : vector<8x1xi32>
    %12 = arith.andi %9, %11 : vector<8x1xi1>
    %13 = arith.andi %7, %12 : vector<8x1xi1>
    %cst = arith.constant dense<0xFF800000> : vector<8xf32>
    %14 = vector.multi_reduction <maximumf>, %0, %cst [1] : vector<8x32xf32> to vector<8xf32>
    %15 = vector.shape_cast %14 : vector<8xf32> to vector<8x1xf32>
    %16 = tpu.iota {dimensions = array<i32: 1>} : vector<8x32xi32>
    %17 = vector.broadcast %1 : vector<8x1xi32> to vector<8x32xi32>
    %18 = arith.cmpi eq, %16, %17 : vector<8x32xi32>
    %cst_4 = arith.constant 0.000000e+00 : f32
    %19 = vector.broadcast %cst_4 : f32 to vector<8x32xf32>
    %20 = arith.select %18, %0, %19 : vector<8x32xi1>, vector<8x32xf32>
    %cst_5 = arith.constant dense<0.000000e+00> : vector<8xf32>
    %21 = vector.multi_reduction <add>, %20, %cst_5 [1] : vector<8x32xf32> to vector<8xf32>
    %22 = vector.shape_cast %21 : vector<8xf32> to vector<8x1xf32>
    %23 = vector.broadcast %15 : vector<8x1xf32> to vector<8x32xf32>
    %24 = arith.subf %0, %23 : vector<8x32xf32>
    %25 = math.exp %24 : vector<8x32xf32>
    %cst_6 = arith.constant dense<0.000000e+00> : vector<8xf32>
    %26 = vector.multi_reduction <add>, %25, %cst_6 [1] : vector<8x32xf32> to vector<8xf32>
    %27 = vector.shape_cast %26 : vector<8xf32> to vector<8x1xf32>
    %28 = math.log %27 : vector<8x1xf32>
    %29 = arith.addf %15, %28 : vector<8x1xf32>
    %30 = arith.subf %29, %22 : vector<8x1xf32>
    %cst_7 = arith.constant 0.000000e+00 : f32
    %31 = vector.broadcast %cst_7 : f32 to vector<8x1xf32>
    %32 = arith.select %13, %30, %31 : vector<8x1xi1>, vector<8x1xf32>
    %33 = arith.extui %13 : vector<8x1xi1> to vector<8x1xi32>
    %34 = arith.sitofp %33 : vector<8x1xi32> to vector<8x1xf32>
    %35 = vector.shape_cast %32 : vector<8x1xf32> to vector<1x8x1xf32>
    %cst_8 = arith.constant dense<0.000000e+00> : vector<1xf32>
    %36 = vector.multi_reduction <add>, %35, %cst_8 [1, 2] : vector<1x8x1xf32> to vector<1xf32>
    %37 = vector.shape_cast %36 : vector<1xf32> to vector<1x1x1xf32>
    %38 = vector.extract %37[0, 0, 0] : f32 from vector<1x1x1xf32>
    %39 = vector.broadcast %38 : f32 to vector<1x1x128xf32>
    %c0_9 = arith.constant 0 : index
    %c0_10 = arith.constant 0 : index
    %c0_11 = arith.constant 0 : index
    %40 = vector.load %arg3[%c0_9, %c0_10, %c0_11] : memref<1x1x128xf32, #tpu.memory_space<vmem>>, vector<1x1x128xf32>
    tpu.vector_store %arg3[%c0_9, %c0_10, %c0_11], %39 {strides = array<i32>} : memref<1x1x128xf32, #tpu.memory_space<vmem>>, vector<1x1x128xf32>,
    %41 = vector.shape_cast %34 : vector<8x1xf32> to vector<1x8x1xf32>
    %cst_12 = arith.constant dense<0.000000e+00> : vector<1xf32>
    %42 = vector.multi_reduction <add>, %41, %cst_12 [1, 2] : vector<1x8x1xf32> to vector<1xf32>
    %43 = vector.shape_cast %42 : vector<1xf32> to vector<1x1x1xf32>
    %44 = vector.extract %43[0, 0, 0] : f32 from vector<1x1x1xf32>
    %45 = vector.broadcast %44 : f32 to vector<1x1x128xf32>
    %c0_13 = arith.constant 0 : index
    %c0_14 = arith.constant 0 : index
    %c0_15 = arith.constant 0 : index
    %46 = vector.load %arg4[%c0_13, %c0_14, %c0_15] : memref<1x1x128xf32, #tpu.memory_space<vmem>>, vector<1x1x128xf32>
    tpu.vector_store %arg4[%c0_13, %c0_14, %c0_15], %45 {strides = array<i32>} : memref<1x1x128xf32, #tpu.memory_space<vmem>>, vector<1x1x128xf32>,
    return
  }
  func.func @transform_0(%arg0: i32) -> (i32, i32) {
    %c0_i32 = arith.constant 0 : i32
    %c0_i32_0 = arith.constant 0 : i32
    return %arg0, %c0_i32 : i32, i32
  }
  func.func @transform_1(%arg0: i32) -> (i32, i32) {
    %c0_i32 = arith.constant 0 : i32
    %c0_i32_0 = arith.constant 0 : i32
    return %arg0, %c0_i32 : i32, i32
  }
  func.func @transform_2(%arg0: i32) -> (i32, i32, i32) {
    %c0_i32 = arith.constant 0 : i32
    %c0_i32_0 = arith.constant 0 : i32
    %c0_i32_1 = arith.constant 0 : i32
    return %arg0, %c0_i32, %c0_i32_0 : i32, i32, i32
  }
  func.func @transform_3(%arg0: i32) -> (i32, i32, i32) {
    %c0_i32 = arith.constant 0 : i32
    %c0_i32_0 = arith.constant 0 : i32
    %c0_i32_1 = arith.constant 0 : i32
    return %arg0, %c0_i32, %c0_i32_0 : i32, i32, i32
  }
}

</mosaic_0001>

<bundles_post_ra>
// kernel: tpu_custom_call.1
= control target key start
LH: loop header
LB: loop body
LE: loop exit
PB: predicated region body
PF: predicated region fallthrough
CT: control target
= control target key end

     0   :  { %9 = vsyncpa [#allocation3], 0  ;;  %vm27_vm0 = vcmask 261120   ;;  %s226_s0 = inlined_call_operand.vmem [shape: f32[8,32], index: 0, kind: input, shape index: {}]   ;;  %s227_s1 = inlined_call_operand.vmem [shape: s32[8,1], index: 1, kind: input, shape index: {}]   ;;  %s228_s2 = inlined_call_operand.hbm [shape: f32[1,1,128], index: 2, kind: output, shape index: {0}]   ;;  %s229_s3 = inlined_call_operand.hbm [shape: f32[1,1,128], index: 3, kind: output, shape index: {1}]  }
   0x1   :  { %v15_v0 = vld [vmem:[%s226_s0] sm:$0xff] }
   0x2   :  { %10 = vsyncpa [#allocation5], 0  ;;  %v28_v1 = vsel %vm27_vm0, %v15_v0, -inf  ;;  %v169_v2 = vmov 0   ;;  %v16_v3 = vld [vmem:[%s227_s1] sm:$0xff]  ;;  %v31_v7 = vlaneseq  ;;  %vm54_vm5 = vcmask 7168  }
   0x3   :  { %116 = vset.pattern.permute.xlu0 %v169_v2  ;;  %vm23_vm2 = vcmp.ge.s32.totalorder %v16_v3, 0  ;;  %vm24_vm3 = vcmp.lt.s32.totalorder %v16_v3, 32  ;;  %v170_v21 = vmov 0.0   ;;  %s171_s0 = smov [#allocation2]   ;;  %s172_s17 = smov [#allocation4]  }
   0x4   :  { %29 = vmax.xlane.f32.xlu0 %v28_v1  ;;  %v32_v8 = vand.u32 127, %v31_v7  ;;  %vm25_vm4 = vmand %vm23_vm2, %vm24_vm3  ;;  %s85_s1 = sshll.u32 %s171_s0, 4  ;;  %s95_s18 = sshll.u32 %s172_s17, 4  ;;  %s86_s1 = int_to_ptr.vmem [resolvable:$true] %s85_s1  ;;  %s96_s18 = int_to_ptr.vmem [resolvable:$true] %s95_s18 }
   0x5   :  { %v107_v22 = vsel %vm25_vm4, 1.0, %v170_v21  ;;  %s121_s19 = scalar_lea.vmem %s86_s1, 16  ;;  %s125_s20 = scalar_lea.vmem %s86_s1, 32 }
   0x6   :  { %v67_v24 = vsel %vm54_vm5, %v107_v22, 0.0  ;;  %p122_p0 = scmp.ne.s32.totalorder %s86_s1, %s121_s19  ;;  %p126_p1 = scmp.lt.s32.totalorder %s86_s1, %s86_s1 }
   0x7   :  { %p127_p2 = scmp.lt.s32.totalorder %s125_s20, %s121_s19 }
   0x9   :  { %p128_p3 = por %p127_p2, %p126_p1 }
   0xb   :  { %p129_p4 = pnand %p128_p3, %p122_p0 }
  0x1a   :  { %34 = vperm.xlu0 %116, %v16_v3  }
  0x91   :  { %v30_v4 = vpop.xlane.xlu0 %29 }
  0x92   :  { %v41_v5 = vsub.f32 %v15_v0, %v30_v4 }
  0x94   :  { %v42_v6 = vmul.f32 1.442695, %v41_v5 }
  0x96   :  { %117 = vpow2.f32 %v42_v6 }
  0x99   :  { %v35_v9 = vpop.permute.xlu0 %34 }
  0x9a   :  { %vm36_vm1 = vcmp.eq.s32.totalorder %v32_v8, %v35_v9 }
  0x9b   :  { %v37_v11 = vsel %vm36_vm1, %v15_v0, 0.0 }
  0x9c   :  { %v38_v13 = vsel %vm27_vm0, %v37_v11, 0.0 }
  0xa0   :  { %v118_v10 = vpop.eup %117 }
  0xa1   :  { %v44_v12 = vsel %vm27_vm0, %v118_v10, 0.0 }
  0xa2   :  { %45 = vadd.xlane.f32.xlu1 %v44_v12 }
  0xa6   :  { %39 = vadd.xlane.f32.xlu1 %v38_v13 }
 0x12f   :  { %v46_v14 = vpop.xlane.xlu1 %45 }
 0x130   :  { %119 = vlog2.f32 %v46_v14 }
 0x133   :  { %v40_v17 = vpop.xlane.xlu1 %39 }
 0x13a   :  { %v120_v15 = vpop.eup %119 }
 0x13b   :  { %v48_v16 = vmul.f32 0.6931472, %v120_v15 }
 0x13d   :  { %v49_v18 = vadd.f32 %v48_v16, %v30_v4 }
 0x13f   :  { %v50_v19 = vsub.f32 %v49_v18, %v40_v17 }
 0x141   :  { %v51_v20 = vsel %vm25_vm4, %v50_v19, 0.0 }
 0x142   :  { %v55_v23 = vsel %vm54_vm5, %v51_v20, 0.0 }
 0x143   :  { %56 = vadd.xlane.f32.xlu1 %v55_v23 }
 0x147   :  { %68 = vadd.xlane.f32.xlu1 %v67_v24 }
 0x1d0   :  { %v57_v25 = vpop.xlane.xlu1 %56 }
 0x1d1   :  { %v58_v26 = vrot.slane %v57_v25, 4 }
 0x1d3   :  { %v59_v27 = vadd.f32 %v58_v26, %v57_v25 }
 0x1d4   :  { %v69_v28 = vpop.xlane.xlu1 %68 }
 0x1d5   :  { %v60_v29 = vrot.slane %v59_v27, 2  ;;  %v70_v30 = vrot.slane %v69_v28, 4 }
 0x1d7   :  { %v71_v31 = vadd.f32 %v70_v30, %v69_v28  ;;  %v61_v32 = vadd.f32 %v60_v29, %v59_v27 }
 0x1d9   :  { %v72_v33 = vrot.slane %v71_v31, 2  ;;  %v62_v34 = vrot.slane %v61_v32, 1 }
 0x1db   :  { %v73_v35 = vadd.f32 %v72_v33, %v71_v31  ;;  %v63_v36 = vadd.f32 %v62_v34, %v61_v32 }
 0x1dd   :  { %108 = vpush %v63_v36  ;;  %v74_v37 = vrot.slane %v73_v35, 1 }
 0x1df   :  { %v75_v38 = vadd.f32 %v74_v37, %v73_v35 }
 0x1e1   :  { %110 = vpush %v75_v38 }
 0x20e   :  { %s109_s16 = spop %108 }
 0x20f   :  { %v65_v39 = vstv %s109_s16 }
 0x210   :  { %66 = vst [vmem:[#allocation2] sm:$0x1] %v65_v39 }
 0x211   :  { %132 = shalt.err (!%p129_p4)
}
 0x212   :  { %s133_s23 = scalar_lea.hbm %s228_s2, 16 }
 0x213   :  { %p134_p5 = scmp.ne.s32.totalorder %s228_s2, %s133_s23  ;;  %p137_p6 = scmp.lt.u32.totalorder %s133_s23, %s228_s2 }
 0x215   :  { %p139_p7 = pnand %p137_p6, %p134_p5 }
 0x217   :  { %142 = shalt.err (!%p139_p7)
}
 0x218   :  { %88 = dma.vmem_to_hbm [thread:$0]  %s86_s1, 16, %s228_s2, [#allocation3]  }
 0x219   :  { %s111_s30 = spop %110  ;;  %s143_s4 = scalar_lea.vmem %s96_s18, 16 }
 0x21a   :  { %v77_v40 = vstv %s111_s30  ;;  %p144_p8 = scmp.ne.s32.totalorder %s96_s18, %s143_s4  ;;  %s147_s5 = scalar_lea.vmem %s96_s18, 32 }
 0x21b   :  { %78 = vst [vmem:[#allocation4] sm:$0x1] %v77_v40  ;;  %p148_p9 = scmp.lt.s32.totalorder %s96_s18, %s96_s18  ;;  %p149_p10 = scmp.lt.s32.totalorder %s147_s5, %s143_s4 }
 0x21d   :  { %p150_p11 = por %p149_p10, %p148_p9 }
 0x21f   :  { %p151_p12 = pnand %p150_p11, %p144_p8 }
 0x221   :  { %154 = shalt.err (!%p151_p12)
}
 0x222   :  { %s155_s8 = scalar_lea.hbm %s229_s3, 16 }
 0x223   :  { %p156_p13 = scmp.ne.s32.totalorder %s229_s3, %s155_s8  ;;  %p159_p0 = scmp.lt.u32.totalorder %s155_s8, %s229_s3 }
 0x225   :  { %p161_p1 = pnand %p159_p0, %p156_p13 }
 0x227   :  { %164 = shalt.err (!%p161_p1)
}
 0x228   :  { %98 = dma.vmem_to_hbm [thread:$0]  %s96_s18, 16, %s229_s3, [#allocation5]  }
 0x229   :  { %165 = dma.done.wait [#allocation3], 16  }
 0x22a   :  { %166 = vsyncadd [#allocation3], 4294967280 }
 0x22b   :  { %167 = dma.done.wait [#allocation5], 16  }
 0x22c   :  { %168 = vsyncadd [#allocation5], 4294967280 }
 0x22d   :  { %105 = vsyncpa [#allocation3], 1 }
 0x22e   :  { %106 = vsyncpa [#allocation5], 1 }

</bundles_post_ra>
